<compile_context>
chip_gen: v7x
topology: tpu7x:2x2x1
jax: 0.10.0
libtpu: 0.0.40
codegen_flags: <defaults>
</compile_context>

<pallas_src>
import functools

import jax
import jax.numpy as jnp
from jax import lax
from jax.experimental import pallas as pl
from jax.experimental.pallas import tpu as pltpu


# Packed "tail" buffer layout: a (_TAIL_ROWS, 1) float32 column holding all
# small per-layer constants (row ranges below; all boundaries 8-aligned).
_B1_LO, _B1_HI = 0, 256          # fc1 bias
_B2_LO, _B2_HI = 256, 384        # fc2 bias
_B3_LO, _B3_HI = 384, 448        # fc3 bias
_W4_LO, _W4_HI = 448, 512        # fc4 weight row (64 values)
_B4_LO, _B4_HI = 512, 513        # fc4 bias (scalar)
_TAIL_ROWS = 520                 # padded to a multiple of 8 sublanes


def _round_up(x, m):
    return (x + m - 1) // m * m


def _choose_batch_tile(B, block_b):
    """Pick the batch tile.

    * tiny B: one full-array block (uses the 'block == full dim' escape).
    * otherwise: 128-lane-aligned tile, capped by block_b, and sized so the
      grid has at least 2 steps (feeds both v7x TensorCores).
    """
    if B <= 256:
        return B
    bb = min(block_b, _round_up(pl.cdiv(B, 2), 128))
    return _round_up(bb, 128)


def _mlp_kernel(x_ref, w1_ref, w2_ref, w3_ref, tail_ref, o_ref):
    """One batch tile.

    x_ref  : (bb, D)  input tile in native row-major layout (float32)
    w*_ref : PyTorch-layout weights (out, in), bf16 or f32
    tail   : packed biases + fc4 weight row (see layout above), float32
    o_ref  : (1, bb)  lane-dense sigmoid outputs
    """
    # fc1 + relu -> (256, bb): contract the feature axis of both operands so
    # the result keeps batch on the lane axis (Mosaic handles the in-VMEM
    # relayout); accumulate in f32.
    xb = x_ref[...].astype(w1_ref.dtype)
    h = lax.dot_general(w1_ref[...], xb,
                        dimension_numbers=(((1,), (1,)), ((), ())),
                        preferred_element_type=jnp.float32)
    h = jnp.maximum(h + tail_ref[_B1_LO:_B1_HI], 0.0)

    # fc2 + relu -> (128, bb); cast to matmul dtype only at the dot.
    h = jnp.dot(w2_ref[...], h.astype(w2_ref.dtype),
                preferred_element_type=jnp.float32)
    h = jnp.maximum(h + tail_ref[_B2_LO:_B2_HI], 0.0)

    # fc3 + relu -> (64, bb)
    h = jnp.dot(w3_ref[...], h.astype(w3_ref.dtype),
                preferred_element_type=jnp.float32)
    h = jnp.maximum(h + tail_ref[_B3_LO:_B3_HI], 0.0)

    # fc4: a (1,64)x(64,bb) matmul would burn a full MXU pass for one output
    # row; do it as a VPU broadcast-multiply + sublane (XLU) reduction.
    z = jnp.sum(h * tail_ref[_W4_LO:_W4_HI], axis=0, keepdims=True)  # (1, bb)
    z = z + tail_ref[_B4_LO:_B4_HI]

    # sigmoid: exp on the EUP; approximate reciprocal also on the EUP.
    o_ref[...] = pl.reciprocal(1.0 + jnp.exp(-z), approx=True).astype(o_ref.dtype)


@functools.partial(jax.jit, static_argnames=("block_b", "use_bf16"))
def deep_model_forward(x, params, *, block_b=4096, use_bf16=True):
    """x: (B, input_dim) float32. params: [(W(out,in), b(out,)), ...] (torch layout)."""
    (w1, b1), (w2, b2), (w3, b3), (w4, b4) = params
    B, D = x.shape
    assert w1.shape[0] == 256 and w2.shape[0] == 128 and w3.shape[0] == 64
    assert w4.shape == (1, 64)

    # Pack all small per-layer constants into one column buffer (single DMA).
    tail = jnp.concatenate(
        [b1.reshape(256, 1), b2.reshape(128, 1), b3.reshape(64, 1),
         w4.reshape(64, 1), b4.reshape(1, 1),
         jnp.zeros((_TAIL_ROWS - 513, 1), jnp.float32)],
        axis=0).astype(jnp.float32)

    mat_dtype = jnp.bfloat16 if use_bf16 else jnp.float32
    w1m, w2m, w3m = (w.astype(mat_dtype) for w in (w1, w2, w3))

    # Batch tile: 128-lane aligned (or the full batch for tiny B); no host-side
    # padding -- Pallas masks the partial last block, and each output column
    # only depends on its own input row, so garbage in the padded region never
    # touches valid results.
    bb = _choose_batch_tile(B, block_b)
    grid = (pl.cdiv(B, bb),)

    # VMEM budget: double-buffered x/out tiles + weights + tail + f32
    # intermediates.  Keep >= 32 MiB, and <= 56 MiB (headroom under v7x's
    # 64 MiB physical VMEM).
    msz = 2 if use_bf16 else 4
    est = (2 * bb * D * 4                                  # x tiles (f32)
           + 2 * bb * 4                                    # output tiles
           + 2 * (w1.size + w2.size + w3.size) * msz       # weights
           + 2 * _TAIL_ROWS * 128 * 4                      # tail pads to lanes
           + (256 + 128 + 64) * bb * 4)                    # f32 intermediates
    vmem_limit = int(min(max(est + (8 << 20), 32 << 20), 56 << 20))

    out = pl.pallas_call(
        _mlp_kernel,
        out_shape=jax.ShapeDtypeStruct((1, B), jnp.float32),
        grid_spec=pltpu.PrefetchScalarGridSpec(
            num_scalar_prefetch=0,
            grid=grid,
            in_specs=[
                pl.BlockSpec((bb, D), lambda i: (i, 0)),       # x tile (native layout)
                pl.BlockSpec(w1m.shape, lambda i: (0, 0)),     # weights: constant block
                pl.BlockSpec(w2m.shape, lambda i: (0, 0)),
                pl.BlockSpec(w3m.shape, lambda i: (0, 0)),
                pl.BlockSpec(tail.shape, lambda i: (0, 0)),    # packed biases + w4
            ],
            out_specs=pl.BlockSpec((1, bb), lambda i: (0, i)),  # lane-dense output
        ),
        compiler_params=pltpu.CompilerParams(
            dimension_semantics=("parallel",),   # grid steps shard across v7x TCs
            vmem_limit_bytes=vmem_limit,
        ),
    )(x, w1m, w2m, w3m, tail)

    return out.reshape(B, 1)


def init_params(key, input_dim):
    """PyTorch nn.Linear layout: weight (out, in), bias (out,), U(-1/sqrt(in), 1/sqrt(in))."""
    dims = [(input_dim, 256), (256, 128), (128, 64), (64, 1)]
    params = []
    for (din, dout) in dims:
        key, kw, kb = jax.random.split(key, 3)
        bound = 1.0 / (din ** 0.5)
        w = jax.random.uniform(kw, (dout, din), jnp.float32, -bound, bound)
        b = jax.random.uniform(kb, (dout,), jnp.float32, -bound, bound)
        params.append((w, b))
    return params


def reference_forward(x, params):
    h = x
    for i, (w, b) in enumerate(params):
        h = jnp.dot(h, w.T, precision=jax.lax.Precision.HIGHEST) + b
        if i < len(params) - 1:
            h = jnp.maximum(h, 0.0)
    return 1.0 / (1.0 + jnp.exp(-h))


if __name__ == "__main__":
    key = jax.random.PRNGKey(0)
    k_x, k_p, k_x2 = jax.random.split(key, 3)

    input_dim = 32
    params = init_params(k_p, input_dim)

    # Small check: f32 matmul path, single full-array block.
    x_small = jax.random.normal(k_x, (8, input_dim), jnp.float32)
    out_small = jax.block_until_ready(
        deep_model_forward(x_small, params, use_bf16=False))
    ref_small = reference_forward(x_small, params)
    assert out_small.shape == (8, 1)
    assert jnp.allclose(out_small, ref_small, atol=2e-2, rtol=2e-2), \
        "f32 path mismatch vs reference"

    # Larger check: bf16 matmul path, multi-step parallel grid with a partial
    # (masked) last batch tile -- exercises the no-pad boundary handling.
    x_big = jax.random.normal(k_x2, (2077, input_dim), jnp.float32)
    out_big = jax.block_until_ready(
        deep_model_forward(x_big, params, block_b=4096, use_bf16=True))
    ref_big = reference_forward(x_big, params)
    assert out_big.shape == (2077, 1)
    assert jnp.allclose(out_big, ref_big, atol=3e-2, rtol=3e-2), \
        "bf16 path mismatch vs reference"

    print("KERNEL_OK")
</pallas_src>

<mosaic_0001>
module attributes {stable_mosaic.version = 11 : i64} {
  func.func @_mlp_kernel(%arg0: i32, %arg1: memref<8x32xf32, #tpu.memory_space<vmem>>, %arg2: memref<256x32xf32, #tpu.memory_space<vmem>>, %arg3: memref<128x256xf32, #tpu.memory_space<vmem>>, %arg4: memref<64x128xf32, #tpu.memory_space<vmem>>, %arg5: memref<520x1xf32, #tpu.memory_space<vmem>>, %arg6: memref<1x8xf32, #tpu.memory_space<vmem>>) attributes {dimension_semantics = [#tpu.dimension_semantics<parallel>], iteration_bounds = array<i64: 1>, scalar_prefetch = 0 : i64, scratch_operands = 0 : i64, tpu.core_type = #tpu.core_type<tc>, window_params = [{transform_indices = @transform_0, window_bounds = array<i64: 8, 32>}, {pipeline_mode = #tpu.pipeline_mode<synchronous>, transform_indices = @transform_1, window_bounds = array<i64: 256, 32>}, {pipeline_mode = #tpu.pipeline_mode<synchronous>, transform_indices = @transform_2, window_bounds = array<i64: 128, 256>}, {pipeline_mode = #tpu.pipeline_mode<synchronous>, transform_indices = @transform_3, window_bounds = array<i64: 64, 128>}, {pipeline_mode = #tpu.pipeline_mode<synchronous>, transform_indices = @transform_4, window_bounds = array<i64: 520, 1>}, {transform_indices = @transform_5, window_bounds = array<i64: 1, 8>}]} {
    %c0 = arith.constant 0 : index
    %c0_0 = arith.constant 0 : index
    %0 = vector.load %arg1[%c0, %c0_0] : memref<8x32xf32, #tpu.memory_space<vmem>>, vector<8x32xf32>
    %c0_1 = arith.constant 0 : index
    %c0_2 = arith.constant 0 : index
    %1 = vector.load %arg2[%c0_1, %c0_2] : memref<256x32xf32, #tpu.memory_space<vmem>>, vector<256x32xf32>
    %cst = arith.constant dense<0.000000e+00> : vector<256x8xf32>
    %2 = tpu.matmul %1, %0, %cst {dimension_numbers = #tpu.dot_dimension_numbers<[1], [1], [0], [0], [0, 0, 1, 0], [], []>} : vector<256x32xf32>, vector<8x32xf32>, vector<256x8xf32> -> vector<256x8xf32>
    %c0_3 = arith.constant 0 : index
    %c0_4 = arith.constant 0 : index
    %3 = vector.load %arg5[%c0_3, %c0_4] : memref<520x1xf32, #tpu.memory_space<vmem>>, vector<256x1xf32>
    %4 = vector.broadcast %3 : vector<256x1xf32> to vector<256x8xf32>
    %5 = arith.addf %2, %4 : vector<256x8xf32>
    %cst_5 = arith.constant 0.000000e+00 : f32
    %6 = vector.broadcast %cst_5 : f32 to vector<256x8xf32>
    %7 = arith.maximumf %5, %6 : vector<256x8xf32>
    %c0_6 = arith.constant 0 : index
    %c0_7 = arith.constant 0 : index
    %8 = vector.load %arg3[%c0_6, %c0_7] : memref<128x256xf32, #tpu.memory_space<vmem>>, vector<128x256xf32>
    %cst_8 = arith.constant dense<0.000000e+00> : vector<128x8xf32>
    %9 = tpu.matmul %8, %7, %cst_8 {dimension_numbers = #tpu.dot_dimension_numbers<[1], [0], [0], [1], [0, 0, 1, 1], [], []>} : vector<128x256xf32>, vector<256x8xf32>, vector<128x8xf32> -> vector<128x8xf32>
    %c256 = arith.constant 256 : index
    %c0_9 = arith.constant 0 : index
    %10 = vector.load %arg5[%c256, %c0_9] : memref<520x1xf32, #tpu.memory_space<vmem>>, vector<128x1xf32>
    %11 = vector.broadcast %10 : vector<128x1xf32> to vector<128x8xf32>
    %12 = arith.addf %9, %11 : vector<128x8xf32>
    %cst_10 = arith.constant 0.000000e+00 : f32
    %13 = vector.broadcast %cst_10 : f32 to vector<128x8xf32>
    %14 = arith.maximumf %12, %13 : vector<128x8xf32>
    %c0_11 = arith.constant 0 : index
    %c0_12 = arith.constant 0 : index
    %15 = vector.load %arg4[%c0_11, %c0_12] : memref<64x128xf32, #tpu.memory_space<vmem>>, vector<64x128xf32>
    %cst_13 = arith.constant dense<0.000000e+00> : vector<64x8xf32>
    %16 = tpu.matmul %15, %14, %cst_13 {dimension_numbers = #tpu.dot_dimension_numbers<[1], [0], [0], [1], [0, 0, 1, 1], [], []>} : vector<64x128xf32>, vector<128x8xf32>, vector<64x8xf32> -> vector<64x8xf32>
    %c384 = arith.constant 384 : index
    %c0_14 = arith.constant 0 : index
    %17 = vector.load %arg5[%c384, %c0_14] : memref<520x1xf32, #tpu.memory_space<vmem>>, vector<64x1xf32>
    %18 = vector.broadcast %17 : vector<64x1xf32> to vector<64x8xf32>
    %19 = arith.addf %16, %18 : vector<64x8xf32>
    %cst_15 = arith.constant 0.000000e+00 : f32
    %20 = vector.broadcast %cst_15 : f32 to vector<64x8xf32>
    %21 = arith.maximumf %19, %20 : vector<64x8xf32>
    %c448 = arith.constant 448 : index
    %c0_16 = arith.constant 0 : index
    %22 = vector.load %arg5[%c448, %c0_16] : memref<520x1xf32, #tpu.memory_space<vmem>>, vector<64x1xf32>
    %23 = vector.broadcast %22 : vector<64x1xf32> to vector<64x8xf32>
    %24 = arith.mulf %21, %23 : vector<64x8xf32>
    %cst_17 = arith.constant dense<0.000000e+00> : vector<8xf32>
    %25 = vector.multi_reduction <add>, %24, %cst_17 [0] : vector<64x8xf32> to vector<8xf32>
    %26 = vector.shape_cast %25 : vector<8xf32> to vector<1x8xf32>
    %c512 = arith.constant 512 : index
    %c0_18 = arith.constant 0 : index
    %27 = vector.load %arg5[%c512, %c0_18] : memref<520x1xf32, #tpu.memory_space<vmem>>, vector<1x1xf32>
    %28 = vector.broadcast %27 : vector<1x1xf32> to vector<1x8xf32>
    %29 = arith.addf %26, %28 : vector<1x8xf32>
    %cst_19 = arith.constant 0.000000e+00 : f32
    %30 = vector.broadcast %cst_19 : f32 to vector<1x8xf32>
    %31 = arith.subf %30, %29 : vector<1x8xf32>
    %32 = math.exp %31 : vector<1x8xf32>
    %cst_20 = arith.constant 1.000000e+00 : f32
    %33 = vector.broadcast %cst_20 : f32 to vector<1x8xf32>
    %34 = arith.addf %33, %32 : vector<1x8xf32>
    %35 = tpu.reciprocal %34 {approx = true} : vector<1x8xf32> -> vector<1x8xf32>
    %c0_21 = arith.constant 0 : index
    %c0_22 = arith.constant 0 : index
    %36 = vector.load %arg6[%c0_21, %c0_22] : memref<1x8xf32, #tpu.memory_space<vmem>>, vector<1x8xf32>
    tpu.vector_store %arg6[%c0_21, %c0_22], %35 {strides = array<i32>} : memref<1x8xf32, #tpu.memory_space<vmem>>, vector<1x8xf32>,
    return
  }
  func.func @transform_0(%arg0: i32) -> (i32, i32) {
    %c0_i32 = arith.constant 0 : i32
    %c0_i32_0 = arith.constant 0 : i32
    return %arg0, %c0_i32 : i32, i32
  }
  func.func @transform_1(%arg0: i32) -> (i32, i32) {
    %c0_i32 = arith.constant 0 : i32
    %c0_i32_0 = arith.constant 0 : i32
    %c0_i32_1 = arith.constant 0 : i32
    return %c0_i32, %c0_i32_0 : i32, i32
  }
  func.func @transform_2(%arg0: i32) -> (i32, i32) {
    %c0_i32 = arith.constant 0 : i32
    %c0_i32_0 = arith.constant 0 : i32
    %c0_i32_1 = arith.constant 0 : i32
    return %c0_i32, %c0_i32_0 : i32, i32
  }
  func.func @transform_3(%arg0: i32) -> (i32, i32) {
    %c0_i32 = arith.constant 0 : i32
    %c0_i32_0 = arith.constant 0 : i32
    %c0_i32_1 = arith.constant 0 : i32
    return %c0_i32, %c0_i32_0 : i32, i32
  }
  func.func @transform_4(%arg0: i32) -> (i32, i32) {
    %c0_i32 = arith.constant 0 : i32
    %c0_i32_0 = arith.constant 0 : i32
    %c0_i32_1 = arith.constant 0 : i32
    return %c0_i32, %c0_i32_0 : i32, i32
  }
  func.func @transform_5(%arg0: i32) -> (i32, i32) {
    %c0_i32 = arith.constant 0 : i32
    %c0_i32_0 = arith.constant 0 : i32
    return %c0_i32, %arg0 : i32, i32
  }
}

</mosaic_0001>

<bundles_post_ra>
// kernel: deep_model_forward.1
= control target key start
LH: loop header
LB: loop body
LE: loop exit
PB: predicated region body
PF: predicated region fallthrough
CT: control target
= control target key end

     0   :  { %vm246_vm0 = vcmask 261120   ;;  %v1527_v3 = vmov 0   ;;  %s2099_s0 = inlined_call_operand.vmem [shape: f32[8,32], index: 0, kind: input, shape index: {}]   ;;  %s2100_s1 = inlined_call_operand.vmem [shape: f32[256,32], index: 1, kind: input, shape index: {}]   ;;  %s2101_s2 = inlined_call_operand.vmem [shape: f32[128,256], index: 2, kind: input, shape index: {}]   ;;  %s2102_s3 = inlined_call_operand.vmem [shape: f32[64,128], index: 3, kind: input, shape index: {}]   ;;  %s2103_s4 = inlined_call_operand.vmem [shape: f32[520,1], index: 4, kind: input, shape index: {}]   ;;  %s2104_s5 = inlined_call_operand.hbm [shape: f32[1,8], index: 5, kind: output, shape index: {}]  }
   0x1   :  { %v21_v0 = vld [vmem:[%s2099_s0] sm:$0xff]  ;;  %1498 = vset.pattern.permute.xlu1 %v1527_v3  ;;  %1497 = vset.pattern.permute.xlu0 %v1527_v3  ;;  %v23_v5 = vld [vmem:[%s2100_s1 + $0x8] sm:$0xff]  ;;  %v24_v8 = vld [vmem:[%s2100_s1 + $0x10] sm:$0xff] }
   0x2   :  { %v70_v1 = vld [vmem:[%s2103_s4 + $0x80] sm:$0xff]  ;;  %1337 = vmatprep.subr.msk.mxu0 %vm246_vm0, %v21_v0  ;;  %v71_v6 = vld [vmem:[%s2103_s4 + $0x88] sm:$0xff]  ;;  %v25_v9 = vld [vmem:[%s2100_s1 + $0x18] sm:$0xff] }
   0x3   :  { %v54_v2 = vld [vmem:[%s2103_s4] sm:$0xff]  ;;  %168 = vperm.xlu0 %1497, %v70_v1   ;;  %1338 = vmatpush3.xpose.msk.msra.mxu0 %vm246_vm0, %v21_v0  ;;  %v55_v7 = vld [vmem:[%s2103_s4 + $0x8] sm:$0xff]  ;;  %v72_v10 = vld [vmem:[%s2103_s4 + $0x90] sm:$0xff] }
   0x4   :  { %v22_v4 = vld [vmem:[%s2100_s1] sm:$0xff]  ;;  %88 = vperm.xlu1 %1498, %v54_v2   ;;  %v73_v11 = vld [vmem:[%s2103_s4 + $0x98] sm:$0xff]  ;;  %v27_v13 = vld [vmem:[%s2100_s1 + $0x28] sm:$0xff] }
   0x5   :  { %1339 = vmatprep.mubr.msk.f32.mxu0 %vm246_vm0, %v22_v4  ;;  %v26_v12 = vld [vmem:[%s2100_s1 + $0x20] sm:$0xff]  ;;  %v56_v14 = vld [vmem:[%s2103_s4 + $0x10] sm:$0xff]  ;;  %v57_v15 = vld [vmem:[%s2103_s4 + $0x18] sm:$0xff] }
   0x6   :  { %1340 = vmatmul.mubr.msk.f32.vlgmr.msra.gmra.mrb[0].mxu0 %vm246_vm0, %v23_v5  ;;  %v28_v16 = vld [vmem:[%s2100_s1 + $0x30] sm:$0xff]  ;;  %v29_v17 = vld [vmem:[%s2100_s1 + $0x38] sm:$0xff]  ;;  %v74_v18 = vld [vmem:[%s2103_s4 + $0xa0] sm:$0xff] }
   0x7   :  { %173 = vperm.xlu0 %1497, %v71_v6   ;;  %1342 = vmatprep.mubr.msk.f32.mxu0 %vm246_vm0, %v24_v8  ;;  %v75_v19 = vld [vmem:[%s2103_s4 + $0xa8] sm:$0xff]  ;;  %v30_v20 = vld [vmem:[%s2100_s1 + $0x40] sm:$0xff]  ;;  %v32_v24 = vld [vmem:[%s2100_s1 + $0x50] sm:$0xff] }
   0x8   :  { %93 = vperm.xlu1 %1498, %v55_v7   ;;  %v31_v21 = vld [vmem:[%s2100_s1 + $0x48] sm:$0xff]  ;;  %v58_v22 = vld [vmem:[%s2103_s4 + $0x20] sm:$0xff]  ;;  %v33_v25 = vld [vmem:[%s2100_s1 + $0x58] sm:$0xff] }
   0x9   :  { %v59_v23 = vld [vmem:[%s2103_s4 + $0x28] sm:$0xff]  ;;  %v76_v26 = vld [vmem:[%s2103_s4 + $0xb0] sm:$0xff]  ;;  %v77_v27 = vld [vmem:[%s2103_s4 + $0xb8] sm:$0xff] }
   0xa   :  { %1343 = vmatmul.mubr.msk.f32.gmra.mrb[2].mxu0 %vm246_vm0, %v25_v9  ;;  %v34_v28 = vld [vmem:[%s2100_s1 + $0x60] sm:$0xff]  ;;  %v35_v29 = vld [vmem:[%s2100_s1 + $0x68] sm:$0xff]  ;;  %v60_v30 = vld [vmem:[%s2103_s4 + $0x30] sm:$0xff] }
   0xb   :  { %178 = vperm.xlu0 %1497, %v72_v10   ;;  %1345 = vmatprep.mubr.msk.f32.mxu0 %vm246_vm0, %v26_v12  ;;  %v61_v31 = vld [vmem:[%s2103_s4 + $0x38] sm:$0xff]  ;;  %v36_v32 = vld [vmem:[%s2100_s1 + $0x70] sm:$0xff]  ;;  %v78_v34 = vld [vmem:[%s2103_s4 + $0xc0] sm:$0xff] }
   0xc   :  { %183 = vperm.xlu1 %1498, %v73_v11   ;;  %v37_v33 = vld [vmem:[%s2100_s1 + $0x78] sm:$0xff]  ;;  %v79_v35 = vld [vmem:[%s2103_s4 + $0xc8] sm:$0xff]  ;;  %v38_v36 = vld [vmem:[%s2100_s1 + $0x80] sm:$0xff] }
   0xe   :  { %1346 = vmatmul.mubr.msk.f32.gmra.mrb[4].mxu0 %vm246_vm0, %v27_v13 }
   0xf   :  { %98 = vperm.xlu0 %1497, %v56_v14   ;;  %1348 = vmatprep.mubr.msk.f32.mxu0 %vm246_vm0, %v28_v16 }
  0x10   :  { %103 = vperm.xlu1 %1498, %v57_v15  }
  0x12   :  { %1349 = vmatmul.mubr.msk.f32.gmra.mrb[6].mxu0 %vm246_vm0, %v29_v17 }
  0x13   :  { %188 = vperm.xlu0 %1497, %v74_v18   ;;  %1351 = vmatprep.mubr.msk.f32.mxu0 %vm246_vm0, %v30_v20 }
  0x14   :  { %193 = vperm.xlu1 %1498, %v75_v19  }
  0x16   :  { %1352 = vmatmul.mubr.msk.f32.gmra.mrb[8].mxu0 %vm246_vm0, %v31_v21 }
  0x17   :  { %108 = vperm.xlu0 %1497, %v58_v22   ;;  %1354 = vmatprep.mubr.msk.f32.mxu0 %vm246_vm0, %v32_v24 }
  0x18   :  { %113 = vperm.xlu1 %1498, %v59_v23  }
  0x1a   :  { %1355 = vmatmul.mubr.msk.f32.gmra.mrb[10].mxu0 %vm246_vm0, %v33_v25 }
  0x1b   :  { %198 = vperm.xlu0 %1497, %v76_v26   ;;  %1357 = vmatprep.mubr.msk.f32.mxu0 %vm246_vm0, %v34_v28 }
  0x1c   :  { %203 = vperm.xlu1 %1498, %v77_v27  }
  0x1e   :  { %1358 = vmatmul.mubr.msk.f32.gmra.mrb[12].mxu0 %vm246_vm0, %v35_v29 }
  0x1f   :  { %118 = vperm.xlu0 %1497, %v60_v30   ;;  %1360 = vmatprep.mubr.msk.f32.mxu0 %vm246_vm0, %v36_v32 }
  0x20   :  { %123 = vperm.xlu1 %1498, %v61_v31  }
  0x21   :  { %10 = vsyncpa [#allocation3], 0  ;;  %v39_v37 = vld [vmem:[%s2100_s1 + $0x88] sm:$0xff]  ;;  %v62_v38 = vld [vmem:[%s2103_s4 + $0x40] sm:$0xff]  ;;  %vm1117_vm1 = vcmask 64512   ;;  %vm1151_vm2 = vcmask 57344  }
  0x22   :  { %1361 = vmatmul.mubr.msk.f32.gmra.mrb[14].mxu0 %vm246_vm0, %v37_v33  ;;  %v63_v39 = vld [vmem:[%s2103_s4 + $0x48] sm:$0xff]  ;;  %v40_v40 = vld [vmem:[%s2100_s1 + $0x90] sm:$0xff]  ;;  %v41_v41 = vld [vmem:[%s2100_s1 + $0x98] sm:$0xff] }
  0x23   :  { %208 = vperm.xlu0 %1497, %v78_v34   ;;  %1363 = vmatprep.mubr.msk.f32.mxu0 %vm246_vm0, %v38_v36  ;;  %v80_v42 = vld [vmem:[%s2103_s4 + $0xd0] sm:$0xff]  ;;  %v81_v43 = vld [vmem:[%s2103_s4 + $0xd8] sm:$0xff]  ;;  %v42_v44 = vld [vmem:[%s2100_s1 + $0xa0] sm:$0xff] }
  0x24   :  { %213 = vperm.xlu1 %1498, %v79_v35   ;;  %v43_v45 = vld [vmem:[%s2100_s1 + $0xa8] sm:$0xff]  ;;  %v64_v46 = vld [vmem:[%s2103_s4 + $0x50] sm:$0xff]  ;;  %v65_v47 = vld [vmem:[%s2103_s4 + $0x58] sm:$0xff] }
  0x25   :  { %v44_v48 = vld [vmem:[%s2100_s1 + $0xb0] sm:$0xff]  ;;  %v45_v49 = vld [vmem:[%s2100_s1 + $0xb8] sm:$0xff]  ;;  %v82_v50 = vld [vmem:[%s2103_s4 + $0xe0] sm:$0xff] }
  0x26   :  { %1364 = vmatmul.mubr.msk.f32.gmra.mrb[16].mxu0 %vm246_vm0, %v39_v37  ;;  %v83_v51 = vld [vmem:[%s2103_s4 + $0xe8] sm:$0xff]  ;;  %v46_v52 = vld [vmem:[%s2100_s1 + $0xc0] sm:$0xff]  ;;  %v48_v56 = vld [vmem:[%s2100_s1 + $0xd0] sm:$0xff] }
  0x27   :  { %128 = vperm.xlu0 %1497, %v62_v38   ;;  %1366 = vmatprep.mubr.msk.f32.mxu0 %vm246_vm0, %v40_v40  ;;  %v47_v53 = vld [vmem:[%s2100_s1 + $0xc8] sm:$0xff]  ;;  %v66_v54 = vld [vmem:[%s2103_s4 + $0x60] sm:$0xff]  ;;  %v49_v57 = vld [vmem:[%s2100_s1 + $0xd8] sm:$0xff] }
  0x28   :  { %133 = vperm.xlu1 %1498, %v63_v39   ;;  %v67_v55 = vld [vmem:[%s2103_s4 + $0x68] sm:$0xff]  ;;  %v84_v58 = vld [vmem:[%s2103_s4 + $0xf0] sm:$0xff]  ;;  %v85_v59 = vld [vmem:[%s2103_s4 + $0xf8] sm:$0xff] }
  0x29   :  { %v50_v60 = vld [vmem:[%s2100_s1 + $0xe0] sm:$0xff]  ;;  %v51_v61 = vld [vmem:[%s2100_s1 + $0xe8] sm:$0xff]  ;;  %v68_v62 = vld [vmem:[%s2103_s4 + $0x70] sm:$0xff] }
  0x2a   :  { %1367 = vmatmul.mubr.msk.f32.gmra.mrb[18].mxu0 %vm246_vm0, %v41_v41  ;;  %v69_v63 = vld [vmem:[%s2103_s4 + $0x78] sm:$0xff]  ;;  %v52_v0 = vld [vmem:[%s2100_s1 + $0xf0] sm:$0xff]  ;;  %v635_v2 = vld [vmem:[%s2103_s4 + $0x100] sm:$0xff] }
  0x2b   :  { %218 = vperm.xlu0 %1497, %v80_v42   ;;  %1369 = vmatprep.mubr.msk.f32.mxu0 %vm246_vm0, %v42_v44  ;;  %v53_v1 = vld [vmem:[%s2100_s1 + $0xf8] sm:$0xff]  ;;  %v636_v3 = vld [vmem:[%s2103_s4 + $0x108] sm:$0xff]  ;;  %v637_v4 = vld [vmem:[%s2103_s4 + $0x110] sm:$0xff] }
  0x2c   :  { %223 = vperm.xlu1 %1498, %v81_v43   ;;  %v638_v5 = vld [vmem:[%s2103_s4 + $0x118] sm:$0xff]  ;;  %v639_v6 = vld [vmem:[%s2103_s4 + $0x120] sm:$0xff]  ;;  %v640_v7 = vld [vmem:[%s2103_s4 + $0x128] sm:$0xff] }
  0x2d   :  { %v641_v8 = vld [vmem:[%s2103_s4 + $0x130] sm:$0xff]  ;;  %v642_v9 = vld [vmem:[%s2103_s4 + $0x138] sm:$0xff]  ;;  %v643_v10 = vld [vmem:[%s2103_s4 + $0x140] sm:$0xff] }
  0x2e   :  { %1370 = vmatmul.mubr.msk.f32.gmra.mrb[20].mxu0 %vm246_vm0, %v43_v45  ;;  %v644_v11 = vld [vmem:[%s2103_s4 + $0x148] sm:$0xff]  ;;  %v645_v12 = vld [vmem:[%s2103_s4 + $0x150] sm:$0xff]  ;;  %v646_v13 = vld [vmem:[%s2103_s4 + $0x158] sm:$0xff] }
  0x2f   :  { %138 = vperm.xlu0 %1497, %v64_v46   ;;  %1372 = vmatprep.mubr.msk.f32.mxu0 %vm246_vm0, %v44_v48  ;;  %v647_v14 = vld [vmem:[%s2103_s4 + $0x160] sm:$0xff]  ;;  %v648_v15 = vld [vmem:[%s2103_s4 + $0x168] sm:$0xff]  ;;  %v649_v16 = vld [vmem:[%s2103_s4 + $0x170] sm:$0xff] }
  0x30   :  { %143 = vperm.xlu1 %1498, %v65_v47   ;;  %v650_v17 = vld [vmem:[%s2103_s4 + $0x178] sm:$0xff]  ;;  %v900_v18 = vld [vmem:[%s2103_s4 + $0x180] sm:$0xff]  ;;  %v901_v19 = vld [vmem:[%s2103_s4 + $0x188] sm:$0xff] }
  0x31   :  { %v902_v20 = vld [vmem:[%s2103_s4 + $0x190] sm:$0xff]  ;;  %v903_v21 = vld [vmem:[%s2103_s4 + $0x198] sm:$0xff]  ;;  %v1061_v22 = vld [vmem:[%s2103_s4 + $0x1c0] sm:$0xff] }
  0x32   :  { %1373 = vmatmul.mubr.msk.f32.gmra.mrb[22].mxu0 %vm246_vm0, %v45_v49  ;;  %v1062_v23 = vld [vmem:[%s2103_s4 + $0x1c8] sm:$0xff]  ;;  %v904_v24 = vld [vmem:[%s2103_s4 + $0x1a0] sm:$0xff]  ;;  %v1063_v25 = vld [vmem:[%s2103_s4 + $0x1d0] sm:$0xff] }
  0x33   :  { %228 = vperm.xlu0 %1497, %v82_v50   ;;  %1375 = vmatprep.mubr.msk.f32.mxu0 %vm246_vm0, %v46_v52  ;;  %v905_v26 = vld [vmem:[%s2103_s4 + $0x1a8] sm:$0xff]  ;;  %v1064_v27 = vld [vmem:[%s2103_s4 + $0x1d8] sm:$0xff]  ;;  %v906_v28 = vld [vmem:[%s2103_s4 + $0x1b0] sm:$0xff] }
  0x34   :  { %233 = vperm.xlu1 %1498, %v83_v51   ;;  %v1065_v29 = vld [vmem:[%s2103_s4 + $0x1e0] sm:$0xff]  ;;  %v907_v30 = vld [vmem:[%s2103_s4 + $0x1b8] sm:$0xff]  ;;  %v1066_v31 = vld [vmem:[%s2103_s4 + $0x1e8] sm:$0xff] }
  0x35   :  { %v1067_v32 = vld [vmem:[%s2103_s4 + $0x1f0] sm:$0xff]  ;;  %v1068_v33 = vld [vmem:[%s2103_s4 + $0x1f8] sm:$0xff]  ;;  %v1139_v34 = vld [vmem:[%s2103_s4 + $0x200] sm:$0x1] }
  0x36   :  { %1376 = vmatmul.mubr.msk.f32.gmra.mrb[24].mxu0 %vm246_vm0, %v47_v53  ;;  %v604_v37 = vld [vmem:[%s2101_s2 + $0x8] sm:$0xff] }
  0x37   :  { %148 = vperm.xlu0 %1497, %v66_v54   ;;  %1378 = vmatprep.mubr.msk.f32.mxu0 %vm246_vm0, %v48_v56 }
  0x38   :  { %153 = vperm.xlu1 %1498, %v67_v55   ;;  %795 = vmatprep.mubr.f32.mxu1 %v604_v37 }
  0x3a   :  { %1379 = vmatmul.mubr.msk.f32.gmra.mrb[26].mxu0 %vm246_vm0, %v49_v57 }
  0x3b   :  { %238 = vperm.xlu0 %1497, %v84_v58   ;;  %1381 = vmatprep.mubr.msk.f32.mxu0 %vm246_vm0, %v50_v60 }
  0x3c   :  { %243 = vperm.xlu1 %1498, %v85_v59  }
  0x3e   :  { %1382 = vmatmul.mubr.msk.f32.gmra.mrb[28].mxu0 %vm246_vm0, %v51_v61 }
  0x3f   :  { %158 = vperm.xlu0 %1497, %v68_v62   ;;  %1384 = vmatprep.mubr.msk.f32.mxu0 %vm246_vm0, %v52_v0 }
  0x40   :  { %163 = vperm.xlu1 %1498, %v69_v63  }
  0x42   :  { %1385 = vmatmul.mubr.msk.f32.gmra.mrb[30].mxu0 %vm246_vm0, %v53_v1 }
  0x43   :  { %653 = vperm.xlu0 %1497, %v635_v2  }
  0x44   :  { %658 = vperm.xlu1 %1498, %v636_v3  }
  0x47   :  { %663 = vperm.xlu0 %1497, %v637_v4  }
  0x48   :  { %668 = vperm.xlu1 %1498, %v638_v5  }
  0x4b   :  { %673 = vperm.xlu0 %1497, %v639_v6  }
  0x4c   :  { %678 = vperm.xlu1 %1498, %v640_v7  }
  0x4f   :  { %683 = vperm.xlu0 %1497, %v641_v8  }
  0x50   :  { %688 = vperm.xlu1 %1498, %v642_v9  }
  0x53   :  { %693 = vperm.xlu0 %1497, %v643_v10  }
  0x54   :  { %698 = vperm.xlu1 %1498, %v644_v11  }
  0x57   :  { %703 = vperm.xlu0 %1497, %v645_v12  }
  0x58   :  { %708 = vperm.xlu1 %1498, %v646_v13  }
  0x5b   :  { %713 = vperm.xlu0 %1497, %v647_v14  }
  0x5c   :  { %718 = vperm.xlu1 %1498, %v648_v15  }
  0x5f   :  { %723 = vperm.xlu0 %1497, %v649_v16  }
  0x60   :  { %728 = vperm.xlu1 %1498, %v650_v17  }
  0x63   :  { %910 = vperm.xlu0 %1497, %v900_v18  }
  0x64   :  { %915 = vperm.xlu1 %1498, %v901_v19  }
  0x67   :  { %920 = vperm.xlu0 %1497, %v902_v20  }
  0x68   :  { %925 = vperm.xlu1 %1498, %v903_v21  }
  0x6b   :  { %1071 = vperm.xlu0 %1497, %v1061_v22  }
  0x6c   :  { %1076 = vperm.xlu1 %1498, %v1062_v23  }
  0x6f   :  { %930 = vperm.xlu0 %1497, %v904_v24  }
  0x70   :  { %1081 = vperm.xlu1 %1498, %v1063_v25  }
  0x73   :  { %935 = vperm.xlu0 %1497, %v905_v26  }
  0x74   :  { %1086 = vperm.xlu1 %1498, %v1064_v27  }
  0x77   :  { %940 = vperm.xlu0 %1497, %v906_v28  }
  0x78   :  { %1091 = vperm.xlu1 %1498, %v1065_v29  }
  0x7b   :  { %945 = vperm.xlu0 %1497, %v907_v30  }
  0x7c   :  { %1096 = vperm.xlu1 %1498, %v1066_v31  }
  0x7f   :  { %1101 = vperm.xlu0 %1497, %v1067_v32  }
  0x80   :  { %1106 = vperm.xlu1 %1498, %v1068_v33  }
  0x82   :  { %v1887_v36 = vpop.permute.xlu0 %168 }
  0x83   :  { %1142 = vperm.xlu0 %1497, %v1139_v34   ;;  %v89_v35 = vpop.permute.xlu1 %88 }
  0x86   :  { %v1892_v39 = vpop.permute.xlu0 %173 }
  0x87   :  { %v94_v38 = vpop.permute.xlu1 %93 }
  0x8a   :  { %v1896_v41 = vpop.permute.xlu0 %178 }
  0x8b   :  { %v1894_v40 = vpop.permute.xlu1 %183 }
  0x8e   :  { %v99_v43 = vpop.permute.xlu0 %98 }
  0x8f   :  { %v104_v42 = vpop.permute.xlu1 %103 }
  0x92   :  { %v1900_v45 = vpop.permute.xlu0 %188 }
  0x93   :  { %v1898_v44 = vpop.permute.xlu1 %193 }
  0x96   :  { %v109_v47 = vpop.permute.xlu0 %108 }
  0x97   :  { %v114_v46 = vpop.permute.xlu1 %113 }
  0x9a   :  { %v1904_v49 = vpop.permute.xlu0 %198 }
  0x9b   :  { %v1902_v48 = vpop.permute.xlu1 %203 }
  0x9e   :  { %v119_v51 = vpop.permute.xlu0 %118 }
  0x9f   :  { %v124_v50 = vpop.permute.xlu1 %123 }
  0xa2   :  { %v1908_v53 = vpop.permute.xlu0 %208 }
  0xa3   :  { %v1906_v52 = vpop.permute.xlu1 %213 }
  0xa6   :  { %v129_v55 = vpop.permute.xlu0 %128 }
  0xa7   :  { %v134_v54 = vpop.permute.xlu1 %133 }
  0xaa   :  { %v1912_v57 = vpop.permute.xlu0 %218 }
  0xab   :  { %v1910_v56 = vpop.permute.xlu1 %223 }
  0xae   :  { %v139_v2 = vpop.permute.xlu0 %138 }
  0xaf   :  { %v144_v63 = vpop.permute.xlu1 %143 }
  0xb2   :  { %v1920_v15 = vpop.permute.xlu0 %228 }
  0xb3   :  { %v1916_v12 = vpop.permute.xlu1 %233 }
  0xb6   :  { %v149_v27 = vpop.permute.xlu0 %148 }
  0xb7   :  { %v154_v24 = vpop.permute.xlu1 %153 }
  0xd9   :  { %v1341_v58 = vpop.f32.mrb[0].mxu0 }
  0xda   :  { %v418_v59 = vadd.f32 %v1341_v58, %v94_v38  ;;  %v412_v60 = vpop.f32.mrb[1].mxu0  ;;  %v1926_v38 = vpop.permute.xlu1 %243 }
  0xdb   :  { %v413_v61 = vadd.f32 %v412_v60, %v89_v35 }
  0xdc   :  { %v572_v62 = vmax.f32 %v418_v59, 0.0 }
  0xdd   :  { %v571_v0 = vmax.f32 %v413_v61, 0.0  ;;  %v1344_v1 = vpop.f32.mrb[2].mxu0 }
  0xde   :  { %v428_v3 = vadd.f32 %v1344_v1, %v104_v42  ;;  %v422_v4 = vpop.f32.mrb[3].mxu0  ;;  %v164_v61 = vpop.permute.xlu1 %163 }
  0xdf   :  { %v423_v5 = vadd.f32 %v422_v4, %v99_v43  ;;  %v1914_v6 = vpack.c.bf16 %v572_v62, %v571_v0 }
  0xe0   :  { %v574_v7 = vmax.f32 %v428_v3, 0.0 }
  0xe1   :  { %v573_v8 = vmax.f32 %v423_v5, 0.0  ;;  %v1347_v9 = vpop.f32.mrb[4].mxu0 }
  0xe2   :  { %v438_v10 = vadd.f32 %v1347_v9, %v114_v46  ;;  %v432_v11 = vpop.f32.mrb[5].mxu0  ;;  %v1930_v46 = vpop.permute.xlu0 %238 }
  0xe3   :  { %v1918_v13 = vpack.c.bf16 %v574_v7, %v573_v8  ;;  %v433_v14 = vadd.f32 %v432_v11, %v109_v47 }
  0xe4   :  { %v576_v16 = vmax.f32 %v438_v10, 0.0 }
  0xe5   :  { %v575_v17 = vmax.f32 %v433_v14, 0.0  ;;  %v1350_v18 = vpop.f32.mrb[6].mxu0 }
  0xe6   :  { %v448_v19 = vadd.f32 %v1350_v18, %v124_v50  ;;  %v442_v20 = vpop.f32.mrb[7].mxu0  ;;  %v159_v0 = vpop.permute.xlu0 %158 }
  0xe7   :  { %v1922_v21 = vpack.c.bf16 %v576_v16, %v575_v17  ;;  %v443_v22 = vadd.f32 %v442_v20, %v119_v51 }
  0xe8   :  { %v578_v23 = vmax.f32 %v448_v19, 0.0 }
  0xe9   :  { %v577_v25 = vmax.f32 %v443_v22, 0.0  ;;  %v1353_v26 = vpop.f32.mrb[8].mxu0 }
  0xea   :  { %v458_v28 = vadd.f32 %v1353_v26, %v134_v54  ;;  %v452_v29 = vpop.f32.mrb[9].mxu0 }
  0xeb   :  { %v1924_v30 = vpack.c.bf16 %v578_v23, %v577_v25  ;;  %v453_v31 = vadd.f32 %v452_v29, %v129_v55 }
  0xec   :  { %v580_v32 = vmax.f32 %v458_v28, 0.0 }
  0xed   :  { %v579_v33 = vmax.f32 %v453_v31, 0.0  ;;  %v1356_v34 = vpop.f32.mrb[10].mxu0 }
  0xee   :  { %v468_v35 = vadd.f32 %v1356_v34, %v144_v63  ;;  %v462_v37 = vpop.f32.mrb[11].mxu0 }
  0xef   :  { %v1928_v42 = vpack.c.bf16 %v580_v32, %v579_v33  ;;  %v463_v43 = vadd.f32 %v462_v37, %v139_v2 }
  0xf0   :  { %v582_v47 = vmax.f32 %v468_v35, 0.0 }
  0xf1   :  { %v581_v50 = vmax.f32 %v463_v43, 0.0  ;;  %v1359_v51 = vpop.f32.mrb[12].mxu0 }
  0xf2   :  { %v478_v54 = vadd.f32 %v1359_v51, %v154_v24  ;;  %v472_v58 = vpop.f32.mrb[13].mxu0 }
  0xf3   :  { %v1932_v59 = vpack.c.bf16 %v582_v47, %v581_v50  ;;  %v473_v55 = vadd.f32 %v472_v58, %v149_v27 }
  0xf4   :  { %v584_v60 = vmax.f32 %v478_v54, 0.0 }
  0xf5   :  { %v583_v62 = vmax.f32 %v473_v55, 0.0  ;;  %v1362_v63 = vpop.f32.mrb[14].mxu0 }
  0xf6   :  { %v488_v1 = vadd.f32 %v1362_v63, %v164_v61  ;;  %v482_v3 = vpop.f32.mrb[15].mxu0 }
  0xf7   :  { %v1934_v4 = vpack.c.bf16 %v584_v60, %v583_v62  ;;  %v483_v2 = vadd.f32 %v482_v3, %v159_v0 }
  0xf8   :  { %v586_v5 = vmax.f32 %v488_v1, 0.0 }
  0xf9   :  { %v585_v7 = vmax.f32 %v483_v2, 0.0  ;;  %v1365_v8 = vpop.f32.mrb[16].mxu0 }
  0xfa   :  { %v498_v9 = vadd.f32 %v1365_v8, %v1892_v39  ;;  %v492_v10 = vpop.f32.mrb[17].mxu0  ;;  %v612_v8 = vld [vmem:[%s2101_s2 + $0x48] sm:$0xff] }
  0xfb   :  { %v1937_v11 = vpack.c.bf16 %v586_v5, %v585_v7  ;;  %v493_v14 = vadd.f32 %v492_v10, %v1887_v36  ;;  %v610_v5 = vld [vmem:[%s2101_s2 + $0x38] sm:$0xff]  ;;  %v609_v7 = vld [vmem:[%s2101_s2 + $0x30] sm:$0xff] }
  0xfc   :  { %v588_v16 = vmax.f32 %v498_v9, 0.0  ;;  %v611_v9 = vld [vmem:[%s2101_s2 + $0x40] sm:$0xff]  ;;  %v614_v10 = vld [vmem:[%s2101_s2 + $0x58] sm:$0xff] }
  0xfd   :  { %v587_v17 = vmax.f32 %v493_v14, 0.0  ;;  %v1368_v18 = vpop.f32.mrb[18].mxu0  ;;  %v616_v14 = vld [vmem:[%s2101_s2 + $0x68] sm:$0xff] }
  0xfe   :  { %v508_v19 = vadd.f32 %v1368_v18, %v1894_v40  ;;  %v502_v20 = vpop.f32.mrb[19].mxu0  ;;  %v617_v18 = vld [vmem:[%s2101_s2 + $0x70] sm:$0xff] }
  0xff   :  { %v503_v22 = vadd.f32 %v502_v20, %v1896_v41  ;;  %v1431_v23 = vpack.c.bf16 %v588_v16, %v587_v17  ;;  %v615_v16 = vld [vmem:[%s2101_s2 + $0x60] sm:$0xff]  ;;  %v618_v17 = vld [vmem:[%s2101_s2 + $0x78] sm:$0xff] }
 0x100   :  { %v590_v24 = vmax.f32 %v508_v19, 0.0  ;;  %v620_v19 = vld [vmem:[%s2101_s2 + $0x88] sm:$0xff]  ;;  %v619_v20 = vld [vmem:[%s2101_s2 + $0x80] sm:$0xff] }
 0x101   :  { %v589_v25 = vmax.f32 %v503_v22, 0.0  ;;  %v1371_v26 = vpop.f32.mrb[20].mxu0  ;;  %1432 = vmatprep.subr.bf16.mxu1 %v1431_v23  ;;  %v622_v22 = vld [vmem:[%s2101_s2 + $0x98] sm:$0xff]  ;;  %v621_v23 = vld [vmem:[%s2101_s2 + $0x90] sm:$0xff] }
 0x102   :  { %v518_v39 = vadd.f32 %v1371_v26, %v1898_v44  ;;  %v512_v27 = vpop.f32.mrb[21].mxu0  ;;  %1434 = vmatpush3.bf16.msra.mxu1 %v1914_v6  ;;  %v626_v26 = vld [vmem:[%s2101_s2 + $0xb8] sm:$0xff] }
 0x103   :  { %v1435_v28 = vpack.c.bf16 %v590_v24, %v589_v25  ;;  %v513_v36 = vadd.f32 %v512_v27, %v1900_v45  ;;  %v624_v24 = vld [vmem:[%s2101_s2 + $0xa8] sm:$0xff]  ;;  %v623_v25 = vld [vmem:[%s2101_s2 + $0xa0] sm:$0xff] }
 0x104   :  { %v592_v29 = vmax.f32 %v518_v39, 0.0  ;;  %v625_v39 = vld [vmem:[%s2101_s2 + $0xb0] sm:$0xff]  ;;  %v628_v27 = vld [vmem:[%s2101_s2 + $0xc8] sm:$0xff] }
 0x105   :  { %v591_v31 = vmax.f32 %v513_v36, 0.0  ;;  %v1374_v32 = vpop.f32.mrb[22].mxu0  ;;  %1436 = vmatprep.subr.bf16.mxu1 %v1435_v28  ;;  %v627_v28 = vld [vmem:[%s2101_s2 + $0xc0] sm:$0xff]  ;;  %v630_v36 = vld [vmem:[%s2101_s2 + $0xd8] sm:$0xff] }
 0x106   :  { %v528_v40 = vadd.f32 %v1374_v32, %v1902_v48  ;;  %v522_v41 = vpop.f32.mrb[23].mxu0  ;;  %1438 = vmatpush3.bf16.msra.mxu1 %v1918_v13  ;;  %v631_v32 = vld [vmem:[%s2101_s2 + $0xe0] sm:$0xff] }
 0x107   :  { %v1439_v33 = vpack.c.bf16 %v592_v29, %v591_v31  ;;  %v523_v34 = vadd.f32 %v522_v41, %v1904_v49  ;;  %v629_v29 = vld [vmem:[%s2101_s2 + $0xd0] sm:$0xff]  ;;  %v632_v31 = vld [vmem:[%s2101_s2 + $0xe8] sm:$0xff] }
 0x108   :  { %v594_v35 = vmax.f32 %v528_v40, 0.0  ;;  %v634_v40 = vld [vmem:[%s2101_s2 + $0xf8] sm:$0xff]  ;;  %v633_v41 = vld [vmem:[%s2101_s2 + $0xf0] sm:$0xff] }
 0x109   :  { %v593_v44 = vmax.f32 %v523_v34, 0.0  ;;  %v1377_v37 = vpop.f32.mrb[24].mxu0  ;;  %1440 = vmatprep.subr.bf16.mxu1 %v1439_v33  ;;  %v892_v33 = vld [vmem:[%s2102_s3] sm:$0xff] }
 0x10a   :  { %v538_v6 = vadd.f32 %v1377_v37, %v1906_v52  ;;  %v532_v43 = vpop.f32.mrb[25].mxu0  ;;  %1442 = vmatpush3.bf16.msra.mxu1 %v1922_v21  ;;  %1419 = vmatprep.mubr.f32.mxu0 %v892_v33 }
 0x10b   :  { %v1443_v45 = vpack.c.bf16 %v594_v35, %v593_v44  ;;  %v533_v47 = vadd.f32 %v532_v43, %v1908_v53 }
 0x10c   :  { %v596_v50 = vmax.f32 %v538_v6, 0.0  ;;  %v654_v6 = vpop.permute.xlu0 %653 }
 0x10d   :  { %v595_v48 = vmax.f32 %v533_v47, 0.0  ;;  %v1380_v51 = vpop.f32.mrb[26].mxu0  ;;  %1444 = vmatprep.subr.bf16.mxu1 %v1443_v45 }
 0x10e   :  { %v548_v13 = vadd.f32 %v1380_v51, %v1910_v56  ;;  %v542_v54 = vpop.f32.mrb[27].mxu0  ;;  %1446 = vmatpush3.bf16.msra.mxu1 %v1924_v30 }
 0x10f   :  { %v1447_v49 = vpack.c.bf16 %v596_v50, %v595_v48  ;;  %v543_v58 = vadd.f32 %v542_v54, %v1912_v57  ;;  %v659_v50 = vpop.permute.xlu1 %658 }
 0x110   :  { %v598_v55 = vmax.f32 %v548_v13, 0.0 }
 0x111   :  { %v597_v52 = vmax.f32 %v543_v58, 0.0  ;;  %v1383_v60 = vpop.f32.mrb[28].mxu0  ;;  %1448 = vmatprep.subr.bf16.mxu1 %v1447_v49 }
 0x112   :  { %v558_v21 = vadd.f32 %v1383_v60, %v1916_v12  ;;  %v552_v61 = vpop.f32.mrb[29].mxu0  ;;  %1450 = vmatpush3.bf16.msra.mxu1 %v1928_v42  ;;  %v664_v60 = vpop.permute.xlu0 %663 }
 0x113   :  { %v1451_v53 = vpack.c.bf16 %v598_v55, %v597_v52  ;;  %v553_v62 = vadd.f32 %v552_v61, %v1920_v15  ;;  %v603_v15 = vld [vmem:[%s2101_s2] sm:$0xff] }
 0x114   :  { %v600_v63 = vmax.f32 %v558_v21, 0.0 }
 0x115   :  { %v599_v56 = vmax.f32 %v553_v62, 0.0  ;;  %v1386_v0 = vpop.f32.mrb[30].mxu0  ;;  %1452 = vmatprep.subr.bf16.mxu1 %v1451_v53  ;;  %v669_v62 = vpop.permute.xlu1 %668 }
 0x116   :  { %v568_v30 = vadd.f32 %v1386_v0, %v1926_v38  ;;  %v562_v1 = vpop.f32.mrb[31].mxu0  ;;  %1454 = vmatpush3.bf16.msra.mxu1 %v1932_v59  ;;  %v606_v38 = vld [vmem:[%s2101_s2 + $0x18] sm:$0xff]  ;;  %v608_v59 = vld [vmem:[%s2101_s2 + $0x28] sm:$0xff] }
 0x117   :  { %v1455_v57 = vpack.c.bf16 %v600_v63, %v599_v56  ;;  %v563_v3 = vadd.f32 %v562_v1, %v1930_v46  ;;  %v605_v46 = vld [vmem:[%s2101_s2 + $0x10] sm:$0xff] }
 0x118   :  { %v602_v2 = vmax.f32 %v568_v30, 0.0 }
 0x119   :  { %v601_v12 = vmax.f32 %v563_v3, 0.0  ;;  %1456 = vmatprep.subr.bf16.mxu1 %v1455_v57 }
 0x11a   :  { %1458 = vmatpush3.bf16.msra.mxu1 %v1934_v4  ;;  %v607_v4 = vld [vmem:[%s2101_s2 + $0x20] sm:$0xff] }
 0x11b   :  { %v1459_v42 = vpack.c.bf16 %v602_v2, %v601_v12  ;;  %v674_v12 = vpop.permute.xlu0 %673 }
 0x11d   :  { %1460 = vmatprep.subr.bf16.mxu1 %v1459_v42 }
 0x11e   :  { %1462 = vmatpush3.bf16.msra.mxu1 %v1937_v11  ;;  %v613_v11 = vld [vmem:[%s2101_s2 + $0x50] sm:$0xff] }
 0x121   :  { %796 = vmatmul.mubr.f32.vlgmr.msra.gmra.mrb[0].mxu1 %v603_v15 }
 0x122   :  { %800 = vmatprep.mubr.f32.mxu1 %v606_v38 }
 0x125   :  { %801 = vmatmul.mubr.f32.gmra.mrb[2].mxu1 %v605_v46  ;;  %v679_v46 = vpop.permute.xlu1 %678 }
 0x126   :  { %805 = vmatprep.mubr.f32.mxu1 %v608_v59 }
 0x129   :  { %806 = vmatmul.mubr.f32.gmra.mrb[4].mxu1 %v607_v4 }
 0x12a   :  { %810 = vmatprep.mubr.f32.mxu1 %v610_v5 }
 0x12d   :  { %811 = vmatmul.mubr.f32.gmra.mrb[6].mxu1 %v609_v7 }
 0x12e   :  { %815 = vmatprep.mubr.f32.mxu1 %v612_v8 }
 0x131   :  { %816 = vmatmul.mubr.f32.gmra.mrb[8].mxu1 %v611_v9 }
 0x132   :  { %820 = vmatprep.mubr.f32.mxu1 %v614_v10 }
 0x135   :  { %821 = vmatmul.mubr.f32.gmra.mrb[10].mxu1 %v613_v11 }
 0x136   :  { %825 = vmatprep.mubr.f32.mxu1 %v616_v14  ;;  %v684_v14 = vpop.permute.xlu0 %683 }
 0x139   :  { %826 = vmatmul.mubr.f32.gmra.mrb[12].mxu1 %v615_v16 }
 0x13a   :  { %830 = vmatprep.mubr.f32.mxu1 %v618_v17 }
 0x13d   :  { %831 = vmatmul.mubr.f32.gmra.mrb[14].mxu1 %v617_v18 }
 0x13e   :  { %835 = vmatprep.mubr.f32.mxu1 %v620_v19  ;;  %v689_v19 = vpop.permute.xlu1 %688 }
 0x141   :  { %836 = vmatmul.mubr.f32.gmra.mrb[16].mxu1 %v619_v20 }
 0x142   :  { %840 = vmatprep.mubr.f32.mxu1 %v622_v22 }
 0x145   :  { %841 = vmatmul.mubr.f32.gmra.mrb[18].mxu1 %v621_v23 }
 0x146   :  { %845 = vmatprep.mubr.f32.mxu1 %v624_v24 }
 0x149   :  { %846 = vmatmul.mubr.f32.gmra.mrb[20].mxu1 %v623_v25 }
 0x14a   :  { %850 = vmatprep.mubr.f32.mxu1 %v626_v26 }
 0x14d   :  { %851 = vmatmul.mubr.f32.gmra.mrb[22].mxu1 %v625_v39 }
 0x14e   :  { %855 = vmatprep.mubr.f32.mxu1 %v628_v27 }
 0x151   :  { %856 = vmatmul.mubr.f32.gmra.mrb[24].mxu1 %v627_v28  ;;  %v694_v28 = vpop.permute.xlu0 %693 }
 0x152   :  { %860 = vmatprep.mubr.f32.mxu1 %v630_v36 }
 0x155   :  { %861 = vmatmul.mubr.f32.gmra.mrb[26].mxu1 %v629_v29 }
 0x156   :  { %865 = vmatprep.mubr.f32.mxu1 %v632_v31 }
 0x159   :  { %866 = vmatmul.mubr.f32.gmra.mrb[28].mxu1 %v631_v32  ;;  %v699_v32 = vpop.permute.xlu1 %698 }
 0x15a   :  { %870 = vmatprep.mubr.f32.mxu1 %v634_v40 }
 0x15d   :  { %871 = vmatmul.mubr.f32.gmra.mrb[30].mxu1 %v633_v41 }
 0x1f4   :  { %v1265_v34 = vpop.f32.mrb[0].mxu1 }
 0x1f5   :  { %v1266_v35 = vpop.f32.mrb[1].mxu1 }
 0x1f6   :  { %v1267_v44 = vadd.f32 %v1266_v35, %v1265_v34 }
 0x1f8   :  { %v1268_v37 = vpop.f32.mrb[2].mxu1  ;;  %v798_v45 = vadd.f32 %v1267_v44, %v654_v6 }
 0x1f9   :  { %v1269_v43 = vpop.f32.mrb[3].mxu1 }
 0x1fa   :  { %v1270_v47 = vadd.f32 %v1269_v43, %v1268_v37  ;;  %v876_v54 = vmax.f32 %v798_v45, 0.0  ;;  %v704_v43 = vpop.permute.xlu0 %703 }
 0x1fc   :  { %v803_v48 = vadd.f32 %v1270_v47, %v659_v50  ;;  %v1271_v51 = vpop.f32.mrb[4].mxu1 }
 0x1fd   :  { %v1272_v13 = vpop.f32.mrb[5].mxu1 }
 0x1fe   :  { %v877_v49 = vmax.f32 %v803_v48, 0.0  ;;  %v1273_v58 = vadd.f32 %v1272_v13, %v1271_v51  ;;  %v709_v48 = vpop.permute.xlu1 %708 }
 0x200   :  { %v1274_v55 = vpop.f32.mrb[6].mxu1  ;;  %v1463_v52 = vpack.c.bf16 %v877_v49, %v876_v54  ;;  %v808_v61 = vadd.f32 %v1273_v58, %v664_v60 }
 0x201   :  { %v1275_v21 = vpop.f32.mrb[7].mxu1 }
 0x202   :  { %v1276_v53 = vadd.f32 %v1275_v21, %v1274_v55  ;;  %1464 = vmatprep.subr.bf16.mxu0 %v1463_v52  ;;  %v878_v30 = vmax.f32 %v808_v61, 0.0  ;;  %v714_v21 = vpop.permute.xlu0 %713 }
 0x203   :  { %1466 = vmatpush3.bf16.msra.mxu0 %v1463_v52 }
 0x204   :  { %v813_v63 = vadd.f32 %v1276_v53, %v669_v62  ;;  %v1277_v56 = vpop.f32.mrb[8].mxu1 }
 0x205   :  { %v1278_v0 = vpop.f32.mrb[9].mxu1 }
 0x206   :  { %v879_v1 = vmax.f32 %v813_v63, 0.0  ;;  %v1279_v57 = vadd.f32 %v1278_v0, %v1277_v56  ;;  %v719_v63 = vpop.permute.xlu1 %718 }
 0x208   :  { %v1280_v3 = vpop.f32.mrb[10].mxu1  ;;  %v1467_v2 = vpack.c.bf16 %v879_v1, %v878_v30  ;;  %v818_v15 = vadd.f32 %v1279_v57, %v674_v12 }
 0x209   :  { %v1281_v42 = vpop.f32.mrb[11].mxu1 }
 0x20a   :  { %v1282_v38 = vadd.f32 %v1281_v42, %v1280_v3  ;;  %1468 = vmatprep.subr.bf16.mxu0 %v1467_v2  ;;  %v880_v7 = vmax.f32 %v818_v15, 0.0  ;;  %v724_v42 = vpop.permute.xlu0 %723 }
 0x20b   :  { %1470 = vmatpush3.bf16.msra.mxu0 %v1467_v2 }
 0x20c   :  { %v823_v59 = vadd.f32 %v1282_v38, %v679_v46  ;;  %v1283_v4 = vpop.f32.mrb[12].mxu1 }
 0x20d   :  { %v1284_v5 = vpop.f32.mrb[13].mxu1 }
 0x20e   :  { %v881_v8 = vmax.f32 %v823_v59, 0.0  ;;  %v1285_v9 = vadd.f32 %v1284_v5, %v1283_v4  ;;  %v729_v59 = vpop.permute.xlu1 %728 }
 0x210   :  { %v1286_v10 = vpop.f32.mrb[14].mxu1  ;;  %v1471_v11 = vpack.c.bf16 %v881_v8, %v880_v7  ;;  %v828_v17 = vadd.f32 %v1285_v9, %v684_v14  ;;  %v893_v9 = vld [vmem:[%s2102_s3 + $0x8] sm:$0xff]  ;;  %v896_v14 = vld [vmem:[%s2102_s3 + $0x20] sm:$0xff] }
 0x211   :  { %v1287_v16 = vpop.f32.mrb[15].mxu1 }
 0x212   :  { %v1288_v18 = vadd.f32 %v1287_v16, %v1286_v10  ;;  %1472 = vmatprep.subr.bf16.mxu0 %v1471_v11  ;;  %v882_v24 = vmax.f32 %v828_v17, 0.0  ;;  %v894_v10 = vld [vmem:[%s2102_s3 + $0x10] sm:$0xff]  ;;  %v897_v16 = vld [vmem:[%s2102_s3 + $0x28] sm:$0xff] }
 0x213   :  { %1474 = vmatpush3.bf16.msra.mxu0 %v1471_v11  ;;  %v895_v11 = vld [vmem:[%s2102_s3 + $0x18] sm:$0xff]  ;;  %v898_v17 = vld [vmem:[%s2102_s3 + $0x30] sm:$0xff] }
 0x214   :  { %v833_v20 = vadd.f32 %v1288_v18, %v689_v19  ;;  %v1289_v22 = vpop.f32.mrb[16].mxu1  ;;  %v899_v18 = vld [vmem:[%s2102_s3 + $0x38] sm:$0xff]  ;;  %v911_v19 = vpop.permute.xlu0 %910  ;;  %s1528_s3 = smov [#allocation2]  }
 0x215   :  { %v1290_v23 = vpop.f32.mrb[17].mxu1  ;;  %s1159_s25 = sshll.u32 %s1528_s3, 4  ;;  %s1160_s25 = int_to_ptr.vmem [resolvable:$true] %s1159_s25 }
 0x216   :  { %v883_v25 = vmax.f32 %v833_v20, 0.0  ;;  %v1291_v26 = vadd.f32 %v1290_v23, %v1289_v22  ;;  %v916_v20 = vpop.permute.xlu1 %915  ;;  %s1503_s1 = scalar_lea.vmem %s1160_s25, 16  ;;  %s1507_s0 = scalar_lea.vmem %s1160_s25, 32 }
 0x217   :  { %p1504_p0 = scmp.ne.s32.totalorder %s1160_s25, %s1503_s1  ;;  %p1508_p1 = scmp.lt.s32.totalorder %s1160_s25, %s1160_s25 }
 0x218   :  { %v1292_v39 = vpop.f32.mrb[18].mxu1  ;;  %v1475_v27 = vpack.c.bf16 %v883_v25, %v882_v24  ;;  %v838_v29 = vadd.f32 %v1291_v26, %v694_v28  ;;  %v921_v22 = vpop.permute.xlu0 %920  ;;  %p1509_p2 = scmp.lt.s32.totalorder %s1507_s0, %s1503_s1 }
 0x219   :  { %v1293_v36 = vpop.f32.mrb[19].mxu1 }
 0x21a   :  { %v1294_v31 = vadd.f32 %v1293_v36, %v1292_v39  ;;  %1476 = vmatprep.subr.bf16.mxu0 %v1475_v27  ;;  %v884_v34 = vmax.f32 %v838_v29, 0.0  ;;  %v926_v23 = vpop.permute.xlu1 %925  ;;  %p1510_p3 = por %p1509_p2, %p1508_p1 }
 0x21b   :  { %1478 = vmatpush3.bf16.msra.mxu0 %v1475_v27 }
 0x21c   :  { %v843_v40 = vadd.f32 %v1294_v31, %v699_v32  ;;  %v1295_v41 = vpop.f32.mrb[20].mxu1  ;;  %v1072_v24 = vpop.permute.xlu0 %1071  ;;  %p1511_p4 = pnand %p1510_p3, %p1504_p0 }
 0x21d   :  { %v1296_v33 = vpop.f32.mrb[21].mxu1 }
 0x21e   :  { %v885_v35 = vmax.f32 %v843_v40, 0.0  ;;  %v1297_v44 = vadd.f32 %v1296_v33, %v1295_v41  ;;  %v1077_v25 = vpop.permute.xlu1 %1076 }
 0x220   :  { %v1298_v37 = vpop.f32.mrb[22].mxu1  ;;  %v1479_v6 = vpack.c.bf16 %v885_v35, %v884_v34  ;;  %v848_v47 = vadd.f32 %v1297_v44, %v704_v43  ;;  %v931_v26 = vpop.permute.xlu0 %930 }
 0x221   :  { %v1299_v45 = vpop.f32.mrb[23].mxu1 }
 0x222   :  { %v1300_v50 = vadd.f32 %v1299_v45, %v1298_v37  ;;  %1480 = vmatprep.subr.bf16.mxu0 %v1479_v6  ;;  %v886_v49 = vmax.f32 %v848_v47, 0.0  ;;  %v1082_v39 = vpop.permute.xlu1 %1081 }
 0x223   :  { %1482 = vmatpush3.bf16.msra.mxu0 %v1479_v6 }
 0x224   :  { %v853_v51 = vadd.f32 %v1300_v50, %v709_v48  ;;  %v1301_v13 = vpop.f32.mrb[24].mxu1  ;;  %v936_v27 = vpop.permute.xlu0 %935 }
 0x225   :  { %v1302_v54 = vpop.f32.mrb[25].mxu1 }
 0x226   :  { %v887_v58 = vmax.f32 %v853_v51, 0.0  ;;  %v1303_v55 = vadd.f32 %v1302_v54, %v1301_v13  ;;  %v1087_v28 = vpop.permute.xlu1 %1086 }
 0x228   :  { %v1304_v52 = vpop.f32.mrb[26].mxu1  ;;  %v1483_v60 = vpack.c.bf16 %v887_v58, %v886_v49  ;;  %v858_v53 = vadd.f32 %v1303_v55, %v714_v21  ;;  %v941_v41 = vpop.permute.xlu0 %940 }
 0x229   :  { %v1305_v61 = vpop.f32.mrb[27].mxu1 }
 0x22a   :  { %v1306_v62 = vadd.f32 %v1305_v61, %v1304_v52  ;;  %1484 = vmatprep.subr.bf16.mxu0 %v1483_v60  ;;  %v888_v1 = vmax.f32 %v858_v53, 0.0  ;;  %v1092_v35 = vpop.permute.xlu1 %1091 }
 0x22b   :  { %1486 = vmatpush3.bf16.msra.mxu0 %v1483_v60 }
 0x22c   :  { %v863_v56 = vadd.f32 %v1306_v62, %v719_v63  ;;  %v1307_v0 = vpop.f32.mrb[28].mxu1  ;;  %v946_v21 = vpop.permute.xlu0 %945 }
 0x22d   :  { %v1308_v30 = vpop.f32.mrb[29].mxu1 }
 0x22e   :  { %v889_v57 = vmax.f32 %v863_v56, 0.0  ;;  %v1309_v3 = vadd.f32 %v1308_v30, %v1307_v0  ;;  %v1097_v61 = vpop.permute.xlu1 %1096 }
 0x230   :  { %v1310_v2 = vpop.f32.mrb[30].mxu1  ;;  %v1487_v12 = vpack.c.bf16 %v889_v57, %v888_v1  ;;  %v868_v38 = vadd.f32 %v1309_v3, %v724_v42 }
 0x231   :  { %v1311_v15 = vpop.f32.mrb[31].mxu1 }
 0x232   :  { %v1312_v46 = vadd.f32 %v1311_v15, %v1310_v2  ;;  %1488 = vmatprep.subr.bf16.mxu0 %v1487_v12  ;;  %v890_v5 = vmax.f32 %v868_v38, 0.0 }
 0x233   :  { %1490 = vmatpush3.bf16.msra.mxu0 %v1487_v12 }
 0x234   :  { %v873_v4 = vadd.f32 %v1312_v46, %v729_v59  ;;  %v1102_v59 = vpop.permute.xlu0 %1101 }
 0x236   :  { %v891_v7 = vmax.f32 %v873_v4, 0.0  ;;  %v1107_v4 = vpop.permute.xlu1 %1106 }
 0x238   :  { %v1491_v8 = vpack.c.bf16 %v891_v7, %v890_v5 }
 0x23a   :  { %1492 = vmatprep.subr.bf16.mxu0 %v1491_v8 }
 0x23b   :  { %1494 = vmatpush3.bf16.msra.mxu0 %v1491_v8 }
 0x23e   :  { %1420 = vmatmul.mubr.f32.vlgmr.msra.gmra.mrb[32].mxu0 %v893_v9 }
 0x23f   :  { %1422 = vmatprep.mubr.f32.mxu0 %v894_v10 }
 0x242   :  { %1423 = vmatmul.mubr.f32.gmra.mrb[34].mxu0 %v895_v11 }
 0x243   :  { %1425 = vmatprep.mubr.f32.mxu0 %v896_v14 }
 0x246   :  { %1426 = vmatmul.mubr.f32.gmra.mrb[36].mxu0 %v897_v16 }
 0x247   :  { %1428 = vmatprep.mubr.f32.mxu0 %v898_v17 }
 0x24a   :  { %1429 = vmatmul.mubr.f32.gmra.mrb[38].mxu0 %v899_v18 }
 0x311   :  { %v1421_v36 = vpop.f32.mrb[32].mxu0 }
 0x312   :  { %v1020_v29 = vadd.f32 %v1421_v36, %v916_v20  ;;  %v1014_v31 = vpop.f32.mrb[33].mxu0 }
 0x313   :  { %v1015_v32 = vadd.f32 %v1014_v31, %v911_v19 }
 0x314   :  { %v1054_v40 = vmax.f32 %v1020_v29, 0.0 }
 0x315   :  { %v1053_v33 = vmax.f32 %v1015_v32, 0.0  ;;  %v1424_v34 = vpop.f32.mrb[34].mxu0 }
 0x316   :  { %v1110_v44 = vmul.f32 %v1077_v25, %v1054_v40  ;;  %v1030_v37 = vadd.f32 %v1424_v34, %v926_v23  ;;  %v1024_v6 = vpop.f32.mrb[35].mxu0  ;;  %v1143_v25 = vpop.permute.xlu0 %1142 }
 0x317   :  { %v1109_v43 = vmul.f32 %v1072_v24, %v1053_v33  ;;  %v1025_v45 = vadd.f32 %v1024_v6, %v921_v22 }
 0x318   :  { %v1119_v47 = vsel %vm1117_vm1, %v1110_v44, 0.0  ;;  %v1056_v50 = vmax.f32 %v1030_v37, 0.0 }
 0x319   :  { %v1118_v48 = vsel %vm1117_vm1, %v1109_v43, 0.0  ;;  %v1055_v51 = vmax.f32 %v1025_v45, 0.0  ;;  %v1427_v13 = vpop.f32.mrb[36].mxu0 }
 0x31a   :  { %v1120_v54 = vadd.f32 %v1119_v47, %v1118_v48  ;;  %v1040_v49 = vadd.f32 %v1427_v13, %v936_v27  ;;  %v1034_v58 = vpop.f32.mrb[37].mxu0  ;;  %v1112_v55 = vmul.f32 %v1087_v28, %v1056_v50 }
 0x31b   :  { %v1111_v52 = vmul.f32 %v1082_v39, %v1055_v51  ;;  %v1035_v60 = vadd.f32 %v1034_v58, %v931_v26 }
 0x31c   :  { %v1058_v53 = vmax.f32 %v1040_v49, 0.0  ;;  %v1123_v57 = vsel %vm1117_vm1, %v1112_v55, 0.0 }
 0x31d   :  { %v1121_v62 = vsel %vm1117_vm1, %v1111_v52, 0.0  ;;  %v1057_v63 = vmax.f32 %v1035_v60, 0.0  ;;  %v1430_v56 = vpop.f32.mrb[38].mxu0 }
 0x31e   :  { %v1122_v0 = vadd.f32 %v1121_v62, %v1120_v54  ;;  %v1050_v30 = vadd.f32 %v1430_v56, %v946_v21  ;;  %v1044_v1 = vpop.f32.mrb[39].mxu0  ;;  %v1114_v3 = vmul.f32 %v1097_v61, %v1058_v53 }
 0x31f   :  { %v1113_v2 = vmul.f32 %v1092_v35, %v1057_v63  ;;  %v1045_v12 = vadd.f32 %v1044_v1, %v941_v41 }
 0x320   :  { %v1124_v42 = vadd.f32 %v1123_v57, %v1122_v0  ;;  %v1060_v15 = vmax.f32 %v1050_v30, 0.0  ;;  %v1127_v7 = vsel %vm1117_vm1, %v1114_v3, 0.0 }
 0x321   :  { %v1125_v38 = vsel %vm1117_vm1, %v1113_v2, 0.0  ;;  %v1059_v46 = vmax.f32 %v1045_v12, 0.0 }
 0x322   :  { %v1126_v5 = vadd.f32 %v1125_v38, %v1124_v42  ;;  %v1116_v8 = vmul.f32 %v1107_v4, %v1060_v15 }
 0x323   :  { %v1115_v9 = vmul.f32 %v1102_v59, %v1059_v46 }
 0x324   :  { %v1128_v10 = vadd.f32 %v1127_v7, %v1126_v5  ;;  %v1131_v16 = vsel %vm1117_vm1, %v1116_v8, 0.0 }
 0x325   :  { %v1129_v11 = vsel %vm1117_vm1, %v1115_v9, 0.0 }
 0x326   :  { %v1130_v14 = vadd.f32 %v1129_v11, %v1128_v10 }
 0x328   :  { %v1132_v17 = vadd.f32 %v1131_v16, %v1130_v14 }
 0x32a   :  { %v1133_v18 = vrot.slane %v1132_v17, 4 }
 0x32c   :  { %v1134_v19 = vadd.f32 %v1133_v18, %v1132_v17 }
 0x32e   :  { %v1135_v20 = vrot.slane %v1134_v19, 2 }
 0x330   :  { %v1136_v22 = vadd.f32 %v1135_v20, %v1134_v19 }
 0x332   :  { %v1137_v23 = vrot.slane %v1136_v22, 1 }
 0x334   :  { %v1138_v24 = vadd.f32 %v1137_v23, %v1136_v22 }
 0x336   :  { %v1145_v26 = vadd.f32 %v1143_v25, %v1138_v24 }
 0x338   :  { %v1146_v39 = vsub.f32 0.0, %v1145_v26 }
 0x33a   :  { %v1147_v27 = vmul.f32 1.442695, %v1146_v39 }
 0x33c   :  { %1499 = vpow2.f32 %v1147_v27 }
 0x346   :  { %v1500_v28 = vpop.eup %1499 }
 0x347   :  { %v1149_v36 = vadd.f32 1.0, %v1500_v28 }
 0x349   :  { %1501 = vrcp.f32 %v1149_v36 }
 0x353   :  { %v1502_v29 = vpop.eup %1501 }
 0x354   :  { %1152 = vst.msk [vmem:[#allocation2] sm:$0x1] %vm1151_vm2, %v1502_v29 }
 0x355   :  { %1514 = shalt.err (!%p1511_p4)
}
 0x356   :  { %s1515_s28 = scalar_lea.hbm %s2104_s5, 16 }
 0x357   :  { %p1516_p5 = scmp.ne.s32.totalorder %s2104_s5, %s1515_s28  ;;  %p1519_p6 = scmp.lt.u32.totalorder %s1515_s28, %s2104_s5 }
 0x359   :  { %p1521_p7 = pnand %p1519_p6, %p1516_p5 }
 0x35b   :  { %1524 = shalt.err (!%p1521_p7)
}
 0x35c   :  { %1162 = dma.vmem_to_hbm [thread:$0]  %s1160_s25, 16, %s2104_s5, [#allocation3]  }
 0x35d   :  { %1525 = dma.done.wait [#allocation3], 16  }
 0x35e   :  { %1526 = vsyncadd [#allocation3], 4294967280 }
 0x35f   :  { %1166 = vsyncpa [#allocation3], 1 }

</bundles_post_ra>
